<compile_context>
chip_gen: v6e
topology: v6e:2x2x1
jax: 0.10.0
libtpu: 0.0.40
codegen_flags: <defaults>
</compile_context>

<pallas_src>
import functools

import jax
import jax.numpy as jnp
from jax.experimental import pallas as pl
from jax.experimental.pallas import tpu as pltpu


def _linear_kernel(x_ref, w_ref, b_ref, o_ref):
    # Hot path: one batch tile -> MXU matmul (f32 accumulate) + bias add (VPU).
    acc = jnp.dot(x_ref[...], w_ref[...], preferred_element_type=jnp.float32)
    o_ref[...] = (acc + b_ref[...]).astype(o_ref.dtype)


def _round_up(x, m):
    return (x + m - 1) // m * m


@functools.partial(jax.jit, static_argnames=("use_bf16",))
def tabular_mlp_forward(x, w_t, b, use_bf16=False):
    """Forward pass of TabularMLP: y = x @ w_t + b.

    x:   [batch, num_inputs]       float32
    w_t: [num_inputs, num_outputs] float32 (PyTorch weight, transposed)
    b:   [1, num_outputs]          float32
    returns [batch, num_outputs]   float32
    """
    batch, num_inputs = x.shape
    _, num_outputs = w_t.shape
    out_dtype = x.dtype

    # Lane-dense padding: K and N up to multiples of 128, M tile multiple of 8.
    k_pad = _round_up(num_inputs, 128)
    n_pad = _round_up(num_outputs, 128)
    tile_m = min(512, _round_up(batch, 8))     # big tiles for pipelining; VMEM-safe
    m_pad = _round_up(batch, tile_m)

    compute_dtype = jnp.bfloat16 if use_bf16 else out_dtype
    x_p = jnp.pad(x, ((0, m_pad - batch), (0, k_pad - num_inputs))).astype(compute_dtype)
    w_p = jnp.pad(
        w_t, ((0, k_pad - num_inputs), (0, n_pad - num_outputs))
    ).astype(compute_dtype)
    b_p = jnp.pad(b, ((0, 0), (0, n_pad - num_outputs))).astype(jnp.float32)

    grid = (m_pad // tile_m,)

    out_padded = pl.pallas_call(
        _linear_kernel,
        out_shape=jax.ShapeDtypeStruct((m_pad, n_pad), out_dtype),
        grid_spec=pltpu.PrefetchScalarGridSpec(
            num_scalar_prefetch=0,
            grid=grid,
            in_specs=[
                # x: tiled along batch, pipelined.
                pl.BlockSpec((tile_m, k_pad), lambda i: (i, 0)),
                # W, b: same block every step -> stay resident in VMEM.
                pl.BlockSpec((k_pad, n_pad), lambda i: (0, 0)),
                pl.BlockSpec((1, n_pad), lambda i: (0, 0)),
            ],
            out_specs=pl.BlockSpec((tile_m, n_pad), lambda i: (i, 0)),
        ),
        compiler_params=pltpu.CompilerParams(
            dimension_semantics=("parallel",),       # megacore on v7x, no-op elsewhere
            vmem_limit_bytes=64 * 1024 * 1024,       # safe on v5e/v6e/v7x with these tiles
        ),
    )(x_p, w_p, b_p)

    # Strip the lane/batch padding added in the wrapper.
    return out_padded[:batch, :num_outputs]


def init_params(key, num_inputs, num_outputs):
    """Deterministic init mirroring torch.nn.Linear (uniform in +/- 1/sqrt(fan_in))."""
    k_w, k_b = jax.random.split(key)
    bound = 1.0 / jnp.sqrt(jnp.float32(num_inputs))
    # PyTorch stores weight as [num_outputs, num_inputs]; we keep the transpose.
    w_t = jax.random.uniform(
        k_w, (num_inputs, num_outputs), jnp.float32, -bound, bound
    )
    b = jax.random.uniform(k_b, (1, num_outputs), jnp.float32, -bound, bound)
    return w_t, b


if __name__ == "__main__":
    key = jax.random.PRNGKey(0)
    k_x, k_p, k_x2 = jax.random.split(key, 3)

    # Small shapes consistent with the module.
    batch = 8
    num_inputs = 32
    num_outputs = 16

    x = jax.random.normal(k_x, (batch, num_inputs), jnp.float32)
    w_t, b = init_params(k_p, num_inputs, num_outputs)

    y = tabular_mlp_forward(x, w_t, b)
    jax.block_until_ready(y)

    y_ref = x @ w_t + b
    assert y.shape == (batch, num_outputs)
    assert jnp.allclose(y, y_ref, atol=1e-5, rtol=1e-5)

    # Exercise the multi-tile / remainder path (grid > 1, padded batch).
    batch2 = 1200
    x2 = jax.random.normal(k_x2, (batch2, num_inputs), jnp.float32)
    y2 = tabular_mlp_forward(x2, w_t, b)
    jax.block_until_ready(y2)
    y2_ref = x2 @ w_t + b
    assert y2.shape == (batch2, num_outputs)
    assert jnp.allclose(y2, y2_ref, atol=1e-5, rtol=1e-5)

    print("KERNEL_OK")
</pallas_src>

<mosaic_0001>
module attributes {stable_mosaic.version = 11 : i64} {
  func.func @_linear_kernel(%arg0: i32, %arg1: memref<8x128xf32, #tpu.memory_space<vmem>>, %arg2: memref<128x128xf32, #tpu.memory_space<vmem>>, %arg3: memref<1x128xf32, #tpu.memory_space<vmem>>, %arg4: memref<8x128xf32, #tpu.memory_space<vmem>>) attributes {dimension_semantics = [#tpu.dimension_semantics<parallel>], iteration_bounds = array<i64: 1>, scalar_prefetch = 0 : i64, scratch_operands = 0 : i64, tpu.core_type = #tpu.core_type<tc>, window_params = [{transform_indices = @transform_0, window_bounds = array<i64: 8, 128>}, {pipeline_mode = #tpu.pipeline_mode<synchronous>, transform_indices = @transform_1, window_bounds = array<i64: 128, 128>}, {pipeline_mode = #tpu.pipeline_mode<synchronous>, transform_indices = @transform_2, window_bounds = array<i64: 1, 128>}, {transform_indices = @transform_3, window_bounds = array<i64: 8, 128>}]} {
    %c0 = arith.constant 0 : index
    %c0_0 = arith.constant 0 : index
    %0 = vector.load %arg1[%c0, %c0_0] : memref<8x128xf32, #tpu.memory_space<vmem>>, vector<8x128xf32>
    %c0_1 = arith.constant 0 : index
    %c0_2 = arith.constant 0 : index
    %1 = vector.load %arg2[%c0_1, %c0_2] : memref<128x128xf32, #tpu.memory_space<vmem>>, vector<128x128xf32>
    %cst = arith.constant dense<0.000000e+00> : vector<8x128xf32>
    %2 = tpu.matmul %0, %1, %cst {dimension_numbers = #tpu.dot_dimension_numbers<[1], [0], [0], [1], [0, 0, 1, 1], [], []>} : vector<8x128xf32>, vector<128x128xf32>, vector<8x128xf32> -> vector<8x128xf32>
    %c0_3 = arith.constant 0 : index
    %c0_4 = arith.constant 0 : index
    %3 = vector.load %arg3[%c0_3, %c0_4] : memref<1x128xf32, #tpu.memory_space<vmem>>, vector<1x128xf32>
    %4 = vector.broadcast %3 : vector<1x128xf32> to vector<8x128xf32>
    %5 = arith.addf %2, %4 : vector<8x128xf32>
    %c0_5 = arith.constant 0 : index
    %c0_6 = arith.constant 0 : index
    %6 = vector.load %arg4[%c0_5, %c0_6] : memref<8x128xf32, #tpu.memory_space<vmem>>, vector<8x128xf32>
    tpu.vector_store %arg4[%c0_5, %c0_6], %5 {strides = array<i32>} : memref<8x128xf32, #tpu.memory_space<vmem>>, vector<8x128xf32>,
    return
  }
  func.func @transform_0(%arg0: i32) -> (i32, i32) {
    %c0_i32 = arith.constant 0 : i32
    %c0_i32_0 = arith.constant 0 : i32
    return %arg0, %c0_i32 : i32, i32
  }
  func.func @transform_1(%arg0: i32) -> (i32, i32) {
    %c0_i32 = arith.constant 0 : i32
    %c0_i32_0 = arith.constant 0 : i32
    %c0_i32_1 = arith.constant 0 : i32
    return %c0_i32, %c0_i32_0 : i32, i32
  }
  func.func @transform_2(%arg0: i32) -> (i32, i32) {
    %c0_i32 = arith.constant 0 : i32
    %c0_i32_0 = arith.constant 0 : i32
    %c0_i32_1 = arith.constant 0 : i32
    return %c0_i32, %c0_i32_0 : i32, i32
  }
  func.func @transform_3(%arg0: i32) -> (i32, i32) {
    %c0_i32 = arith.constant 0 : i32
    %c0_i32_0 = arith.constant 0 : i32
    return %arg0, %c0_i32 : i32, i32
  }
}

</mosaic_0001>

<bundles_post_ra>
// kernel: tabular_mlp_forward.1
= control target key start
LH: loop header
LB: loop body
LE: loop exit
PB: predicated region body
PF: predicated region fallthrough
CT: control target
= control target key end

     0   :  { %v202_v1 = vmov 0.0   ;;  %vm203_vm0 = vmmov 0   ;;  %s282_s0 = inlined_call_operand.vmem [shape: f32[8,128], index: 0, kind: input, shape index: {}]   ;;  %s283_s1 = inlined_call_operand.vmem [shape: f32[128,128], index: 1, kind: input, shape index: {}]   ;;  %s284_s2 = inlined_call_operand.vmem [shape: f32[1,128], index: 2, kind: input, shape index: {}]   ;;  %s285_s3 = inlined_call_operand.hbm [shape: f32[8,128], index: 3, kind: output, shape index: {}]  }
   0x1   :  { %v31_v0 = vld [vmem:[%s283_s1 + $0x78] sm:$0xff]  ;;  %142 = vmatprep.subr.mxu0 %v202_v1  ;;  %v30_v2 = vld [vmem:[%s283_s1 + $0x70] sm:$0xff]  ;;  %174 = vmatprep.mubr.msk.f32.mxu0 %vm203_vm0, %v202_v1  ;;  %v29_v3 = vld [vmem:[%s283_s1 + $0x68] sm:$0xff] }
   0x2   :  { %143 = vmatpush3.msra.mxu0 %v31_v0  ;;  %v28_v4 = vld [vmem:[%s283_s1 + $0x60] sm:$0xff] }
   0x3   :  { %144 = vmatprep.subr.mxu0 %v202_v1 }
   0x4   :  { %145 = vmatpush3.msra.mxu0 %v30_v2 }
   0x5   :  { %146 = vmatprep.subr.mxu0 %v202_v1 }
   0x6   :  { %147 = vmatpush3.msra.mxu0 %v29_v3 }
   0x7   :  { %8 = vsyncpa [#allocation3], 0  ;;  %148 = vmatprep.subr.mxu0 %v202_v1  ;;  %v27_v5 = vld [vmem:[%s283_s1 + $0x58] sm:$0xff]  ;;  %v26_v6 = vld [vmem:[%s283_s1 + $0x50] sm:$0xff]  ;;  %s204_s21 = smov [#allocation2]  }
   0x8   :  { %149 = vmatpush3.msra.mxu0 %v28_v4  ;;  %v25_v7 = vld [vmem:[%s283_s1 + $0x48] sm:$0xff]  ;;  %v24_v8 = vld [vmem:[%s283_s1 + $0x40] sm:$0xff]  ;;  %v23_v9 = vld [vmem:[%s283_s1 + $0x38] sm:$0xff]  ;;  %s116_s22 = sshll.u32 %s204_s21, 4  ;;  %s117_s22 = int_to_ptr.vmem [resolvable:$true] %s116_s22 }
   0x9   :  { %150 = vmatprep.subr.mxu0 %v202_v1  ;;  %v22_v10 = vld [vmem:[%s283_s1 + $0x30] sm:$0xff]  ;;  %v21_v11 = vld [vmem:[%s283_s1 + $0x28] sm:$0xff]  ;;  %v20_v12 = vld [vmem:[%s283_s1 + $0x20] sm:$0xff]  ;;  %p185_p1 = scmp.lt.s32.totalorder %s117_s22, %s117_s22 }
   0xa   :  { %151 = vmatpush3.msra.mxu0 %v27_v5  ;;  %v19_v13 = vld [vmem:[%s283_s1 + $0x18] sm:$0xff]  ;;  %v18_v14 = vld [vmem:[%s283_s1 + $0x10] sm:$0xff]  ;;  %v17_v15 = vld [vmem:[%s283_s1 + $0x8] sm:$0xff] }
   0xb   :  { %152 = vmatprep.subr.mxu0 %v202_v1  ;;  %v16_v16 = vld [vmem:[%s283_s1] sm:$0xff]  ;;  %s180_s1 = scalar_lea.vmem %s117_s22, 128 }
   0xc   :  { %153 = vmatpush3.msra.mxu0 %v26_v6  ;;  %v15_v17 = vld [vmem:[%s282_s0] sm:$0xff]  ;;  %p181_p0 = scmp.ne.s32.totalorder %s117_s22, %s180_s1  ;;  %p186_p2 = scmp.lt.s32.totalorder %s180_s1, %s180_s1 }
   0xd   :  { %154 = vmatprep.subr.mxu0 %v202_v1  ;;  %v124_v18 = vld [vmem:[%s284_s2] ss:$0 sm:$0xff] }
   0xe   :  { %155 = vmatpush3.msra.mxu0 %v25_v7  ;;  %p187_p3 = por %p186_p2, %p185_p1 }
   0xf   :  { %156 = vmatprep.subr.mxu0 %v202_v1 }
  0x10   :  { %157 = vmatpush3.msra.mxu0 %v24_v8  ;;  %p188_p4 = pnand %p187_p3, %p181_p0 }
  0x11   :  { %158 = vmatprep.subr.mxu0 %v202_v1 }
  0x12   :  { %159 = vmatpush3.msra.mxu0 %v23_v9 }
  0x13   :  { %160 = vmatprep.subr.mxu0 %v202_v1 }
  0x14   :  { %161 = vmatpush3.msra.mxu0 %v22_v10 }
  0x15   :  { %162 = vmatprep.subr.mxu0 %v202_v1 }
  0x16   :  { %163 = vmatpush3.msra.mxu0 %v21_v11 }
  0x17   :  { %164 = vmatprep.subr.mxu0 %v202_v1 }
  0x18   :  { %165 = vmatpush3.msra.mxu0 %v20_v12 }
  0x19   :  { %166 = vmatprep.subr.mxu0 %v202_v1 }
  0x1a   :  { %167 = vmatpush3.msra.mxu0 %v19_v13 }
  0x1b   :  { %168 = vmatprep.subr.mxu0 %v202_v1 }
  0x1c   :  { %169 = vmatpush3.msra.mxu0 %v18_v14 }
  0x1d   :  { %170 = vmatprep.subr.mxu0 %v202_v1 }
  0x1e   :  { %171 = vmatpush3.msra.mxu0 %v17_v15 }
  0x1f   :  { %172 = vmatprep.subr.mxu0 %v202_v1 }
  0x20   :  { %173 = vmatpush3.msra.mxu0 %v16_v16 }
  0x21   :  { %175 = vmatmul.mubr.f32.vlgmr.msra.gmra.mxu0 %v15_v17 }
  0xe1   :  { %v105_v19 = vpop.f32.mrf.mxu0 }
  0xe2   :  { %v106_v20 = vadd.f32 %v124_v18, %v105_v19 }
  0xe3   :  { %v176_v21 = vpop.f32.mrf.mxu0 }
  0xe4   :  { %109 = vst [vmem:[#allocation2] sm:$0xff] %v106_v20 }
  0xe5   :  { %191 = shalt.err (!%p188_p4)
}
  0xe6   :  { %119 = dma.vmem_to_hbm [thread:$0]  %s117_s22, 128, %s285_s3, [#allocation3]  }
  0xe7   :  { %200 = dma.done.wait [#allocation3], 128  }
  0xe8   :  { %201 = vsyncadd [#allocation3], 4294967168 }
  0xe9   :  { %123 = vsyncpa [#allocation3], 1 }

</bundles_post_ra>
